<compile_context>
chip_gen: v7x
topology: tpu7x:2x2x1
jax: 0.10.0
libtpu: 0.0.40
codegen_flags: <defaults>
</compile_context>

<pallas_src>
import jax
import jax.numpy as jnp
from jax.experimental import pallas as pl
from jax.experimental.pallas import tpu as pltpu


def _transpose_tile_kernel(x_ref, o_ref):
    # x_ref: (TH, TW), o_ref: (TW, TH) -- plain 2D transpose (XLU vxpose path).
    o_ref[...] = x_ref[...].T


def _transpose_slab_kernel(x_ref, o_ref):
    # x_ref: (TBC, H, W), o_ref: (TBC, W, H) -- batched transpose of the two minor dims.
    o_ref[...] = jnp.swapaxes(x_ref[...], 1, 2)


_TILE_CANDIDATES = (512, 256, 128)   # lane/sublane friendly tiles (multiples of 128)
_MAX_TILE = 512                      # per-dim tile cap for the tiled path
_SLAB_BUDGET = 4 << 20               # ~4 MiB payload per grid step on the slab path
_SLAB_MAX_SLICE = 4 << 20            # a single (H, W) slice above this -> use tiled path


def _pick_tile(dim):
    """Largest 128-multiple tile (<=512) that evenly divides `dim`, else the full dim."""
    for t in _TILE_CANDIDATES:
        if dim % t == 0:
            return t
    return dim


def transpose_2_3(x):
    """Pallas TPU implementation of torch.transpose(x, 2, 3) for a 4D tensor."""
    B, C, H, W = x.shape
    BC = B * C
    itemsize = jnp.dtype(x.dtype).itemsize
    x3 = x.reshape(BC, H, W)  # fuse batch & channel (free, contiguity preserving)

    TH = _pick_tile(H)
    TW = _pick_tile(W)
    slice_bytes = H * W * itemsize
    use_tiled = (TH < H) or (TW < W) or (slice_bytes > _SLAB_MAX_SLICE)

    if use_tiled:
        # Large spatial dims: explicit H/W tiling.  Tiles are 128-multiples wherever the dim
        # allows, so input loads and output stores are lane-dense (unmasked vst) on both sides
        # of the transpose.  If a large dim has no 128-multiple divisor, tile it at 512 anyway
        # and let Pallas mask the partial boundary block -> VMEM stays bounded.
        if TH == H and H > _MAX_TILE:
            TH = _MAX_TILE
        if TW == W and W > _MAX_TILE:
            TW = _MAX_TILE
        block_bytes = TH * TW * itemsize
        vmem_limit = int(min(max(8 * block_bytes, 4 << 20), 48 << 20))
        out3 = pl.pallas_call(
            _transpose_tile_kernel,
            out_shape=jax.ShapeDtypeStruct((BC, W, H), x.dtype),
            grid_spec=pltpu.PrefetchScalarGridSpec(
                num_scalar_prefetch=0,
                grid=(BC, pl.cdiv(H, TH), pl.cdiv(W, TW)),
                in_specs=[
                    pl.BlockSpec((pl.Squeezed(), TH, TW),
                                 lambda n, i, j: (n, i, j)),
                ],
                out_specs=pl.BlockSpec((pl.Squeezed(), TW, TH),
                                       lambda n, i, j: (n, j, i)),
            ),
            compiler_params=pltpu.CompilerParams(
                dimension_semantics=("parallel", "parallel", "parallel"),
                vmem_limit_bytes=vmem_limit,
            ),
        )(x3)
    else:
        # Small / medium spatial dims: keep the full (H, W) slice in the block and pack as many
        # (b, c) slices per grid step as fit a ~4 MiB payload budget -> few grid steps, large
        # contiguous DMAs on both read and write sides.
        tbc = max(1, min(BC, _SLAB_BUDGET // max(slice_bytes, 1)))
        while BC % tbc != 0:
            tbc -= 1
        block_bytes = tbc * slice_bytes
        vmem_limit = int(min(max(8 * block_bytes, 4 << 20), 48 << 20))
        out3 = pl.pallas_call(
            _transpose_slab_kernel,
            out_shape=jax.ShapeDtypeStruct((BC, W, H), x.dtype),
            grid_spec=pltpu.PrefetchScalarGridSpec(
                num_scalar_prefetch=0,
                grid=(BC // tbc,),
                in_specs=[pl.BlockSpec((tbc, H, W), lambda n: (n, 0, 0))],
                out_specs=pl.BlockSpec((tbc, W, H), lambda n: (n, 0, 0)),
            ),
            compiler_params=pltpu.CompilerParams(
                dimension_semantics=("parallel",),
                vmem_limit_bytes=vmem_limit,
            ),
        )(x3)

    return out3.reshape(B, C, W, H)


if __name__ == "__main__":
    key = jax.random.PRNGKey(0)

    # Primary (module-sized) check: B=2, C=4, H=W=16 -> fused-BC slab path.
    x = jax.random.normal(key, (2, 4, 16, 16), dtype=jnp.float32)
    out = jax.block_until_ready(transpose_2_3(x))
    ref = jnp.swapaxes(x, 2, 3)
    assert out.shape == (2, 4, 16, 16)
    assert out.dtype == x.dtype
    assert bool(jnp.array_equal(out, ref))

    # Rectangular small-spatial check (catches any H/W orientation mix-up on the slab path).
    xr = jax.random.normal(jax.random.PRNGKey(2), (2, 3, 8, 32), dtype=jnp.float32)
    outr = jax.block_until_ready(transpose_2_3(xr))
    assert outr.shape == (2, 3, 32, 8)
    assert bool(jnp.array_equal(outr, jnp.swapaxes(xr, 2, 3)))

    # Check exercising the lane-dense H/W-tiled path (TH=128, TW=256).
    x2 = jax.random.normal(jax.random.PRNGKey(1), (1, 2, 384, 256), dtype=jnp.float32)
    out2 = jax.block_until_ready(transpose_2_3(x2))
    assert out2.shape == (1, 2, 256, 384)
    assert bool(jnp.array_equal(out2, jnp.swapaxes(x2, 2, 3)))

    print("KERNEL_OK")
</pallas_src>

<mosaic_0001>
module attributes {stable_mosaic.version = 11 : i64} {
  func.func @_transpose_slab_kernel(%arg0: i32, %arg1: memref<8x16x16xf32, #tpu.memory_space<vmem>>, %arg2: memref<8x16x16xf32, #tpu.memory_space<vmem>>) attributes {dimension_semantics = [#tpu.dimension_semantics<parallel>], iteration_bounds = array<i64: 1>, scalar_prefetch = 0 : i64, scratch_operands = 0 : i64, tpu.core_type = #tpu.core_type<tc>, window_params = [{transform_indices = @transform_0, window_bounds = array<i64: 8, 16, 16>}, {transform_indices = @transform_1, window_bounds = array<i64: 8, 16, 16>}]} {
    %c0 = arith.constant 0 : index
    %c0_0 = arith.constant 0 : index
    %c0_1 = arith.constant 0 : index
    %0 = vector.load %arg1[%c0, %c0_0, %c0_1] : memref<8x16x16xf32, #tpu.memory_space<vmem>>, vector<8x16x16xf32>
    %1 = tpu.transpose %0, [0, 2, 1] : vector<8x16x16xf32> -> vector<8x16x16xf32>
    %c0_2 = arith.constant 0 : index
    %c0_3 = arith.constant 0 : index
    %c0_4 = arith.constant 0 : index
    %2 = vector.load %arg2[%c0_2, %c0_3, %c0_4] : memref<8x16x16xf32, #tpu.memory_space<vmem>>, vector<8x16x16xf32>
    tpu.vector_store %arg2[%c0_2, %c0_3, %c0_4], %1 {strides = array<i32>} : memref<8x16x16xf32, #tpu.memory_space<vmem>>, vector<8x16x16xf32>,
    return
  }
  func.func @transform_0(%arg0: i32) -> (i32, i32, i32) {
    %c0_i32 = arith.constant 0 : i32
    %c0_i32_0 = arith.constant 0 : i32
    %c0_i32_1 = arith.constant 0 : i32
    return %arg0, %c0_i32, %c0_i32_0 : i32, i32, i32
  }
  func.func @transform_1(%arg0: i32) -> (i32, i32, i32) {
    %c0_i32 = arith.constant 0 : i32
    %c0_i32_0 = arith.constant 0 : i32
    %c0_i32_1 = arith.constant 0 : i32
    return %arg0, %c0_i32, %c0_i32_0 : i32, i32, i32
  }
}

</mosaic_0001>

<bundles_post_ra>
// kernel: tpu_custom_call.1
= control target key start
LH: loop header
LB: loop body
LE: loop exit
PB: predicated region body
PF: predicated region fallthrough
CT: control target
= control target key end

     0   :  { %6 = vsyncpa [#allocation3], 0  ;;  %s442_s0 = inlined_call_operand.hbm [shape: f32[8,16,16], index: 0, kind: input, shape index: {}]   ;;  %s443_s1 = inlined_call_operand.hbm [shape: f32[8,16,16], index: 1, kind: output, shape index: {}]  }
   0x1   :  { %7 = vsyncpa [#allocation4], 0  ;;  %s382_s6 = smov [#allocation2]   ;;  %s334_s10 = scalar_lea.hbm %s442_s0, 2048 }
   0x2   :  { %s13_s7 = sshll.u32 %s382_s6, 4  ;;  %p335_p0 = scmp.ne.s32.totalorder %s442_s0, %s334_s10  ;;  %s14_s7 = int_to_ptr.vmem [resolvable:$true] %s13_s7 }
   0x3   :  { %p338_p1 = scmp.lt.u32.totalorder %s334_s10, %s442_s0 }
   0x5   :  { %p340_p2 = pnand %p338_p1, %p335_p0 }
   0x7   :  { %343 = shalt.err (!%p340_p2)
}
   0x8   :  { %s344_s15 = scalar_lea.vmem %s14_s7, 2048  ;;  %p349_p4 = scmp.lt.s32.totalorder %s14_s7, %s14_s7 }
   0x9   :  { %p345_p3 = scmp.ne.s32.totalorder %s14_s7, %s344_s15  ;;  %p350_p5 = scmp.lt.s32.totalorder %s344_s15, %s344_s15 }
   0xb   :  { %p351_p6 = por %p350_p5, %p349_p4 }
   0xd   :  { %p352_p7 = pnand %p351_p6, %p345_p3 }
   0xf   :  { %355 = shalt.err (!%p352_p7)
}
  0x10   :  { %s383_s16 = smov 128   ;;  %s384_s17 = smov 8  }
  0x11   :  { %19 = dma.hbm_to_vmem [thread:$0]  %s442_s0, 2048, %s14_s7, [#allocation3], %s383_s16, %s383_s16, %s384_s17  }
  0x12   :  { %378 = dma.done.wait [#allocation3], 2048  }
  0x13   :  { %379 = vsyncadd [#allocation3], 4294965248  ;;  %v25_v0 = vld [vmem:[#allocation2 + $0x10] sm:$0xff]  ;;  %v23_v1 = vld [vmem:[#allocation2] sm:$0xff]  ;;  %vm295_vm0 = vcmask 130048   ;;  %s385_s0 = smov [#allocation5]  }
  0x14   :  { %71 = vxpose.xlu1.b32.start [1/2] (short) (narrow) %v25_v0, 16  ;;  %39 = vxpose.xlu0.b32.start [1/2] (short) (narrow) %v23_v1, 16  ;;  %v26_v2 = vld [vmem:[#allocation2 + $0x18] sm:$0xff]  ;;  %v24_v3 = vld [vmem:[#allocation2 + $0x8] sm:$0xff]  ;;  %v29_v4 = vld [vmem:[#allocation2 + $0x30] sm:$0xff]  ;;  %s317_s20 = sshll.u32 %s385_s0, 4  ;;  %s318_s20 = int_to_ptr.vmem [resolvable:$true] %s317_s20 }
  0x15   :  { %v27_v5 = vld [vmem:[#allocation2 + $0x20] sm:$0xff]  ;;  %v30_v6 = vld [vmem:[#allocation2 + $0x38] sm:$0xff]  ;;  %v28_v7 = vld [vmem:[#allocation2 + $0x28] sm:$0xff]  ;;  %s356_s21 = scalar_lea.vmem %s318_s20, 2048  ;;  %p361_p9 = scmp.lt.s32.totalorder %s318_s20, %s318_s20 }
  0x16   :  { %v33_v8 = vld [vmem:[#allocation2 + $0x50] sm:$0xff]  ;;  %v31_v9 = vld [vmem:[#allocation2 + $0x40] sm:$0xff]  ;;  %v34_v10 = vld [vmem:[#allocation2 + $0x58] sm:$0xff]  ;;  %p357_p8 = scmp.ne.s32.totalorder %s318_s20, %s356_s21  ;;  %p362_p10 = scmp.lt.s32.totalorder %s356_s21, %s356_s21 }
  0x17   :  { %v32_v11 = vld [vmem:[#allocation2 + $0x48] sm:$0xff]  ;;  %v37_v12 = vld [vmem:[#allocation2 + $0x70] sm:$0xff]  ;;  %v35_v13 = vld [vmem:[#allocation2 + $0x60] sm:$0xff] }
  0x18   :  { %72 = vxpose.xlu1.b32.end [2/2] (short) (narrow) %v26_v2, 16  ;;  %40 = vxpose.xlu0.b32.end [2/2] (short) (narrow) %v24_v3, 16  ;;  %v38_v14 = vld [vmem:[#allocation2 + $0x78] sm:$0xff]  ;;  %v36_v15 = vld [vmem:[#allocation2 + $0x68] sm:$0xff]  ;;  %p363_p11 = por %p362_p10, %p361_p9 }
  0x1a   :  { %p364_p12 = pnand %p363_p11, %p357_p8 }
  0x1c   :  { %135 = vxpose.xlu1.b32.start [1/2] (short) (narrow) %v29_v4, 16  ;;  %103 = vxpose.xlu0.b32.start [1/2] (short) (narrow) %v27_v5, 16 }
  0x20   :  { %136 = vxpose.xlu1.b32.end [2/2] (short) (narrow) %v30_v6, 16  ;;  %104 = vxpose.xlu0.b32.end [2/2] (short) (narrow) %v28_v7, 16 }
  0x24   :  { %199 = vxpose.xlu1.b32.start [1/2] (short) (narrow) %v33_v8, 16  ;;  %167 = vxpose.xlu0.b32.start [1/2] (short) (narrow) %v31_v9, 16 }
  0x28   :  { %200 = vxpose.xlu1.b32.end [2/2] (short) (narrow) %v34_v10, 16  ;;  %168 = vxpose.xlu0.b32.end [2/2] (short) (narrow) %v32_v11, 16 }
  0x2c   :  { %263 = vxpose.xlu1.b32.start [1/2] (short) (narrow) %v37_v12, 16  ;;  %231 = vxpose.xlu0.b32.start [1/2] (short) (narrow) %v35_v13, 16 }
  0x30   :  { %264 = vxpose.xlu1.b32.end [2/2] (short) (narrow) %v38_v14, 16  ;;  %232 = vxpose.xlu0.b32.end [2/2] (short) (narrow) %v36_v15, 16 }
  0x94   :  { %v87_v16 = vpop.trf.xlu1  ;;  %v55_v17 = vpop.trf.xlu0 }
  0x95   :  { %298 = vst.msk [vmem:[#allocation5 + $0x10] sm:$0xff] %vm295_vm0, %v87_v16  ;;  %296 = vst.msk [vmem:[#allocation5] sm:$0xff] %vm295_vm0, %v55_v17 }
  0x98   :  { %v88_v18 = vpop.trf.xlu1  ;;  %v56_v19 = vpop.trf.xlu0 }
  0x99   :  { %299 = vst.msk [vmem:[#allocation5 + $0x18] sm:$0xff] %vm295_vm0, %v88_v18  ;;  %297 = vst.msk [vmem:[#allocation5 + $0x8] sm:$0xff] %vm295_vm0, %v56_v19 }
  0x9c   :  { %v151_v20 = vpop.trf.xlu1  ;;  %v119_v21 = vpop.trf.xlu0 }
  0x9d   :  { %302 = vst.msk [vmem:[#allocation5 + $0x30] sm:$0xff] %vm295_vm0, %v151_v20  ;;  %300 = vst.msk [vmem:[#allocation5 + $0x20] sm:$0xff] %vm295_vm0, %v119_v21 }
  0xa0   :  { %v152_v22 = vpop.trf.xlu1  ;;  %v120_v23 = vpop.trf.xlu0 }
  0xa1   :  { %303 = vst.msk [vmem:[#allocation5 + $0x38] sm:$0xff] %vm295_vm0, %v152_v22  ;;  %301 = vst.msk [vmem:[#allocation5 + $0x28] sm:$0xff] %vm295_vm0, %v120_v23 }
  0xa4   :  { %v215_v24 = vpop.trf.xlu1  ;;  %v183_v25 = vpop.trf.xlu0 }
  0xa5   :  { %306 = vst.msk [vmem:[#allocation5 + $0x50] sm:$0xff] %vm295_vm0, %v215_v24  ;;  %304 = vst.msk [vmem:[#allocation5 + $0x40] sm:$0xff] %vm295_vm0, %v183_v25 }
  0xa8   :  { %v216_v26 = vpop.trf.xlu1  ;;  %v184_v27 = vpop.trf.xlu0 }
  0xa9   :  { %307 = vst.msk [vmem:[#allocation5 + $0x58] sm:$0xff] %vm295_vm0, %v216_v26  ;;  %305 = vst.msk [vmem:[#allocation5 + $0x48] sm:$0xff] %vm295_vm0, %v184_v27 }
  0xac   :  { %v279_v28 = vpop.trf.xlu1  ;;  %v247_v29 = vpop.trf.xlu0 }
  0xad   :  { %310 = vst.msk [vmem:[#allocation5 + $0x70] sm:$0xff] %vm295_vm0, %v279_v28  ;;  %308 = vst.msk [vmem:[#allocation5 + $0x60] sm:$0xff] %vm295_vm0, %v247_v29 }
  0xb0   :  { %v280_v30 = vpop.trf.xlu1  ;;  %v248_v31 = vpop.trf.xlu0 }
  0xb1   :  { %311 = vst.msk [vmem:[#allocation5 + $0x78] sm:$0xff] %vm295_vm0, %v280_v30  ;;  %309 = vst.msk [vmem:[#allocation5 + $0x68] sm:$0xff] %vm295_vm0, %v248_v31 }
  0xb2   :  { %367 = shalt.err (!%p364_p12)
}
  0xb3   :  { %s368_s24 = scalar_lea.hbm %s443_s1, 2048 }
  0xb4   :  { %p369_p13 = scmp.ne.s32.totalorder %s443_s1, %s368_s24  ;;  %p372_p0 = scmp.lt.u32.totalorder %s368_s24, %s443_s1 }
  0xb6   :  { %p374_p1 = pnand %p372_p0, %p369_p13 }
  0xb8   :  { %377 = shalt.err (!%p374_p1)
}
  0xb9   :  { %323 = dma.vmem_to_hbm [thread:$0]  %s318_s20, 2048, %s443_s1, [#allocation4], %s383_s16, %s383_s16, %s384_s17  }
  0xba   :  { %380 = dma.done.wait [#allocation4], 2048  }
  0xbb   :  { %381 = vsyncadd [#allocation4], 4294965248 }
  0xbc   :  { %327 = vsyncpa [#allocation3], 1 }
  0xbd   :  { %328 = vsyncpa [#allocation4], 1 }

</bundles_post_ra>
